<compile_context>
chip_gen: v7x
topology: tpu7x:2x2x1
jax: 0.10.0
libtpu: 0.0.40
codegen_flags: <defaults>
</compile_context>

<pallas_src>
import functools

import jax
import jax.numpy as jnp
from jax.experimental import pallas as pl
from jax.experimental.pallas import tpu as pltpu

MARGIN = 1.0  # module default; any margin works (diagonal handled exactly)


def _mmr_tile_kernel(n_rows, compute_dtype, x_ref, tcol_ref, trow_ref, o_ref):
    """Partial sum of max(x[i,j], t_i) + max(x[i,j], t_j) over one (TM, n) row tile."""
    tm = x_ref.shape[0]
    # Keep the maxes in `compute_dtype` (bf16 on v6e/v7x for bf16 inputs ->
    # packed vregs, fewer VALU slots); widen only for the add + reduction.
    x = x_ref[...].astype(compute_dtype)
    t_col = tcol_ref[...].astype(compute_dtype)   # (TM, 1): d_i - M for this tile's rows
    t_row = trow_ref[...].astype(compute_dtype)   # (1,  n): d_j - M for every column

    m_col = jnp.maximum(x, t_col)
    m_row = jnp.maximum(x, t_row)
    contrib = m_col.astype(jnp.float32) + m_row.astype(jnp.float32)

    # Lane reduction immediately -> (TM, 1); keeps vreg pressure low.
    row_sums = jnp.sum(contrib, axis=-1, keepdims=True)

    # Mask rows past the true matrix size (ragged last tile reads undefined data;
    # elementwise select is NaN-safe).
    row_ids = (pl.program_id(0) * tm
               + jax.lax.broadcasted_iota(jnp.int32, (tm, 1), 0))
    row_sums = jnp.where(row_ids < n_rows, row_sums, 0.0)

    # Lane-dense (8,128) partial-sum block, distinct per grid step.
    o_ref[...] = jnp.full(o_ref.shape, jnp.sum(row_sums), dtype=jnp.float32)


def _device_kind():
    try:
        return jax.devices()[0].device_kind.lower()
    except Exception:
        return ""


def _compute_dtype(in_dtype):
    """bf16 maxes only where the VPU is bf16-capable (v6e/v7x); else widen to f32."""
    kind = _device_kind()
    if jnp.dtype(in_dtype) == jnp.dtype(jnp.bfloat16) and ("v6" in kind or "v7" in kind):
        return jnp.bfloat16
    return jnp.float32


def _vmem_limit_bytes():
    """Chip-aware scoped-VMEM limit: 64 MiB on 128-MiB parts, ~38 MiB on v7x."""
    try:
        cap = int(pltpu.get_tpu_info().vmem_capacity_bytes)
    except Exception:
        cap = 64 * 1024 * 1024        # conservative: v7x physical VMEM
    cap = max(cap, 32 * 1024 * 1024)
    return min(64 * 1024 * 1024, int(cap * 0.6))


def _choose_tile_rows(n, in_itemsize, compute_itemsize, vmem_limit):
    """Biggest row tile whose *full* working set fits comfortably in the limit."""
    # Per row of the x tile:
    #   * input tile, double-buffered by the pipeline: 2 * in_itemsize
    #   * compute-dtype copy of x (identity for f32 inputs) + f32 contrib
    #     + slack for unfused temps: compute_itemsize + 8
    per_row = n * (2 * in_itemsize + compute_itemsize + 8)
    budget = int(vmem_limit * 0.7)                 # headroom for resident d_row,
    tm = budget // max(1, per_row)                 # output blocks, bookkeeping
    tm = min(tm, 2048)
    tm = min(tm, ((n + 7) // 8) * 8)               # no point exceeding padded row count
    tm = max(8, (tm // 8) * 8)                     # sublane alignment
    return tm


def _dimension_semantics():
    kind = _device_kind()
    if "v7" in kind:
        # v7x has 2 TensorCores per chip; make the split real.
        return (pltpu.CORE_PARALLEL,)
    return ("parallel",)


def max_margin_ranking_loss(x, margin=MARGIN, tm=None):
    n = x.shape[0]
    assert x.shape == (n, n)
    # NOTE: n == 1 has no off-diagonal pairs; like the PyTorch module (mean of an
    # empty tensor) the result is NaN (0/0 normalization). Not guarded on purpose.
    in_itemsize = jnp.dtype(x.dtype).itemsize
    compute_dtype = _compute_dtype(x.dtype)
    compute_itemsize = jnp.dtype(compute_dtype).itemsize

    vmem_limit = _vmem_limit_bytes()
    if tm is None:
        tm = _choose_tile_rows(n, in_itemsize, compute_itemsize, vmem_limit)
    tm = max(8, (int(tm) // 8) * 8)
    num_tiles = pl.cdiv(n, tm)

    # Thresholds t = d - M, rounded to the kernel's compute dtype so the
    # wrapper-side closed-form corrections use *exactly* the values the kernel
    # compares against (exact for f32; consistent for bf16 maxes).
    diag = jnp.diagonal(x).astype(jnp.float32)
    thr_c = (diag - margin).astype(compute_dtype)
    thr32 = thr_c.astype(jnp.float32)
    t_col = thr32.reshape(n, 1)   # sliced per row tile  (d_i - M)
    t_row = thr32.reshape(1, n)   # resident full-width  (d_j - M)

    def _call(dim_sem):
        return pl.pallas_call(
            functools.partial(_mmr_tile_kernel, n, compute_dtype),
            out_shape=jax.ShapeDtypeStruct((num_tiles, 8, 128), jnp.float32),
            grid=(num_tiles,),
            in_specs=[
                pl.BlockSpec((tm, n), lambda i: (i, 0)),   # x row tile, input dtype
                pl.BlockSpec((tm, 1), lambda i: (i, 0)),   # thresholds for this tile's rows
                pl.BlockSpec((1, n), lambda i: (0, 0)),    # full threshold row, resident
            ],
            out_specs=pl.BlockSpec((1, 8, 128), lambda i: (i, 0, 0)),
            compiler_params=pltpu.CompilerParams(
                dimension_semantics=dim_sem,
                vmem_limit_bytes=vmem_limit,
            ),
        )(x, t_col, t_row)

    dim_sem = _dimension_semantics()
    try:
        partials = _call(dim_sem)
    except Exception:
        if dim_sem == ("parallel",):
            raise
        partials = _call(("parallel",))   # safe fallback if CORE_PARALLEL is rejected

    # S = sum over the FULL matrix of max(x_ij, t_i) + max(x_ij, t_j).
    total_max_sum = jnp.sum(partials[:, 0, 0])
    # Full-matrix relu sum: subtract the telescoped linear term sum_ij (t_i + t_j).
    full_relu_sum = total_max_sum - 2.0 * n * jnp.sum(thr32)
    # Remove the diagonal's exact contribution 2 * relu(d_i - t_i) (== 2*M*n
    # when thresholds are exact f32).
    diag_relu_sum = 2.0 * jnp.sum(jnp.maximum(diag - thr32, 0.0))
    off_diag_sum = full_relu_sum - diag_relu_sum
    # TODO(synk): for n >= ~32k, consider pairwise summation of the per-tile
    # partials if f32 accumulation tolerance ever tightens.
    return off_diag_sum / (2.0 * n * (n - 1))


def _reference_loss(x, margin=MARGIN):
    # Pure-JAX reproduction of the PyTorch forward (fix_norm=True).
    n = x.shape[0]
    xf = x.astype(jnp.float32)
    d = jnp.diag(xf)
    x1 = jnp.broadcast_to(d[:, None], (n, n)).reshape(-1)
    x1 = jnp.concatenate([x1, x1], axis=0)
    x2 = jnp.concatenate([xf.reshape(-1), xf.T.reshape(-1)], axis=0)
    mm = jax.nn.relu(margin - (x1 - x2))
    keep = jnp.ones((n, n)) - jnp.eye(n)
    keep_full = jnp.concatenate([keep.reshape(-1), keep.T.reshape(-1)], axis=0)
    return jnp.sum(mm * keep_full) / jnp.sum(keep_full)


if __name__ == "__main__":
    key = jax.random.PRNGKey(0)

    # Case 1: aligned matrix, auto tile size (single tile for n=256).
    n1 = 256
    x1 = jax.random.normal(key, (n1, n1), dtype=jnp.float32)
    loss1 = max_margin_ranking_loss(x1)
    jax.block_until_ready(loss1)
    ref1 = _reference_loss(x1)
    assert jnp.allclose(loss1, ref1, atol=1e-5, rtol=1e-5), (loss1, ref1)

    # Case 2: unaligned n + forced small tile -> multi-tile grid with ragged last tile.
    n2 = 200
    x2 = jax.random.normal(jax.random.fold_in(key, 1), (n2, n2), dtype=jnp.float32)
    loss2 = max_margin_ranking_loss(x2, tm=64)
    jax.block_until_ready(loss2)
    ref2 = _reference_loss(x2)
    assert jnp.allclose(loss2, ref2, atol=1e-5, rtol=1e-5), (loss2, ref2)

    # Case 3: bf16 input (DMA stays bf16; on v6e/v7x the maxes run natively in
    # bf16 against bf16-rounded thresholds, hence the slightly looser tolerance).
    x3 = x1.astype(jnp.bfloat16)
    loss3 = max_margin_ranking_loss(x3, tm=64)
    jax.block_until_ready(loss3)
    ref3 = _reference_loss(x3.astype(jnp.float32))
    assert jnp.allclose(loss3, ref3, atol=5e-4, rtol=5e-4), (loss3, ref3)

    print("KERNEL_OK")
</pallas_src>

<mosaic_0001>
module attributes {stable_mosaic.version = 11 : i64} {
  func.func @_mmr_tile_kernel(%arg0: i32, %arg1: memref<256x256xf32, #tpu.memory_space<vmem>>, %arg2: memref<256x1xf32, #tpu.memory_space<vmem>>, %arg3: memref<1x256xf32, #tpu.memory_space<vmem>>, %arg4: memref<1x8x128xf32, #tpu.memory_space<vmem>>) attributes {dimension_semantics = [#tpu.dimension_semantics<parallel>], iteration_bounds = array<i64: 1>, scalar_prefetch = 0 : i64, scratch_operands = 0 : i64, tpu.core_type = #tpu.core_type<tc>, window_params = [{transform_indices = @transform_0, window_bounds = array<i64: 256, 256>}, {transform_indices = @transform_1, window_bounds = array<i64: 256, 1>}, {pipeline_mode = #tpu.pipeline_mode<synchronous>, transform_indices = @transform_2, window_bounds = array<i64: 1, 256>}, {transform_indices = @transform_3, window_bounds = array<i64: 1, 8, 128>}]} {
    %c0 = arith.constant 0 : index
    %c0_0 = arith.constant 0 : index
    %0 = vector.load %arg1[%c0, %c0_0] : memref<256x256xf32, #tpu.memory_space<vmem>>, vector<256x256xf32>
    %c0_1 = arith.constant 0 : index
    %c0_2 = arith.constant 0 : index
    %1 = vector.load %arg2[%c0_1, %c0_2] : memref<256x1xf32, #tpu.memory_space<vmem>>, vector<256x1xf32>
    %c0_3 = arith.constant 0 : index
    %c0_4 = arith.constant 0 : index
    %2 = vector.load %arg3[%c0_3, %c0_4] : memref<1x256xf32, #tpu.memory_space<vmem>>, vector<1x256xf32>
    %3 = vector.broadcast %1 : vector<256x1xf32> to vector<256x256xf32>
    %4 = arith.maximumf %0, %3 : vector<256x256xf32>
    %5 = vector.broadcast %2 : vector<1x256xf32> to vector<256x256xf32>
    %6 = arith.maximumf %0, %5 : vector<256x256xf32>
    %7 = arith.addf %4, %6 : vector<256x256xf32>
    %cst = arith.constant dense<0.000000e+00> : vector<256xf32>
    %8 = vector.multi_reduction <add>, %7, %cst [1] : vector<256x256xf32> to vector<256xf32>
    %9 = vector.shape_cast %8 : vector<256xf32> to vector<256x1xf32>
    %c256_i32 = arith.constant 256 : i32
    %10 = arith.muli %arg0, %c256_i32 : i32
    %11 = tpu.iota {dimensions = array<i32: 0>} : vector<256x1xi32>
    %12 = vector.broadcast %10 : i32 to vector<256x1xi32>
    %13 = arith.addi %12, %11 : vector<256x1xi32>
    %c256_i32_5 = arith.constant 256 : i32
    %14 = vector.broadcast %c256_i32_5 : i32 to vector<256x1xi32>
    %15 = arith.cmpi slt, %13, %14 : vector<256x1xi32>
    %cst_6 = arith.constant 0.000000e+00 : f32
    %16 = vector.broadcast %cst_6 : f32 to vector<256x1xf32>
    %17 = arith.select %15, %9, %16 : vector<256x1xi1>, vector<256x1xf32>
    %18 = vector.shape_cast %17 : vector<256x1xf32> to vector<1x256x1xf32>
    %cst_7 = arith.constant dense<0.000000e+00> : vector<1xf32>
    %19 = vector.multi_reduction <add>, %18, %cst_7 [1, 2] : vector<1x256x1xf32> to vector<1xf32>
    %20 = vector.shape_cast %19 : vector<1xf32> to vector<1x1x1xf32>
    %21 = vector.extract %20[0, 0, 0] : f32 from vector<1x1x1xf32>
    %22 = vector.broadcast %21 : f32 to vector<1x8x128xf32>
    %c0_8 = arith.constant 0 : index
    %c0_9 = arith.constant 0 : index
    %c0_10 = arith.constant 0 : index
    %23 = vector.load %arg4[%c0_8, %c0_9, %c0_10] : memref<1x8x128xf32, #tpu.memory_space<vmem>>, vector<1x8x128xf32>
    tpu.vector_store %arg4[%c0_8, %c0_9, %c0_10], %22 {strides = array<i32>} : memref<1x8x128xf32, #tpu.memory_space<vmem>>, vector<1x8x128xf32>,
    return
  }
  func.func @transform_0(%arg0: i32) -> (i32, i32) {
    %c0_i32 = arith.constant 0 : i32
    %c0_i32_0 = arith.constant 0 : i32
    return %arg0, %c0_i32 : i32, i32
  }
  func.func @transform_1(%arg0: i32) -> (i32, i32) {
    %c0_i32 = arith.constant 0 : i32
    %c0_i32_0 = arith.constant 0 : i32
    return %arg0, %c0_i32 : i32, i32
  }
  func.func @transform_2(%arg0: i32) -> (i32, i32) {
    %c0_i32 = arith.constant 0 : i32
    %c0_i32_0 = arith.constant 0 : i32
    %c0_i32_1 = arith.constant 0 : i32
    return %c0_i32, %c0_i32_0 : i32, i32
  }
  func.func @transform_3(%arg0: i32) -> (i32, i32, i32) {
    %c0_i32 = arith.constant 0 : i32
    %c0_i32_0 = arith.constant 0 : i32
    %c0_i32_1 = arith.constant 0 : i32
    return %arg0, %c0_i32, %c0_i32_0 : i32, i32, i32
  }
}

</mosaic_0001>

<bundles_post_ra>
// kernel: tpu_custom_call.1
= control target key start
LH: loop header
LB: loop body
LE: loop exit
PB: predicated region body
PF: predicated region fallthrough
CT: control target
= control target key end

     0   :  { %8 = vsyncpa [#allocation3], 0  ;;  %s1111_s0 = inlined_call_operand.hbm [shape: f32[256,256], index: 0, kind: input, shape index: {}]   ;;  %s1112_s1 = inlined_call_operand.vmem [shape: f32[256,1], index: 1, kind: input, shape index: {}]   ;;  %s1113_s2 = inlined_call_operand.vmem [shape: f32[1,256], index: 2, kind: input, shape index: {}]   ;;  %s1114_s3 = inlined_call_operand.hbm [shape: f32[1,8,128], index: 3, kind: output, shape index: {}]  }
   0x1   :  { %9 = vsyncpa [#allocation4], 0  ;;  %s863_s12 = smov [#allocation2]   ;;  %s815_s16 = scalar_lea.hbm %s1111_s0, 8192 }
   0x2   :  { %s15_s13 = sshll.u32 %s863_s12, 4  ;;  %p816_p0 = scmp.ne.s32.totalorder %s1111_s0, %s815_s16  ;;  %s16_s13 = int_to_ptr.vmem [resolvable:$true] %s15_s13 }
   0x3   :  { %p819_p1 = scmp.lt.u32.totalorder %s815_s16, %s1111_s0 }
   0x5   :  { %p821_p2 = pnand %p819_p1, %p816_p0 }
   0x7   :  { %824 = shalt.err (!%p821_p2)
}
   0x8   :  { %s825_s21 = scalar_lea.vmem %s16_s13, 8192  ;;  %p830_p4 = scmp.lt.s32.totalorder %s16_s13, %s16_s13 }
   0x9   :  { %p826_p3 = scmp.ne.s32.totalorder %s16_s13, %s825_s21  ;;  %p831_p5 = scmp.lt.s32.totalorder %s825_s21, %s825_s21 }
   0xb   :  { %p832_p6 = por %p831_p5, %p830_p4 }
   0xd   :  { %p833_p7 = pnand %p832_p6, %p826_p3 }
   0xf   :  { %836 = shalt.err (!%p833_p7)
}
  0x10   :  { %s864_s22 = smov 256   ;;  %s865_s23 = smov 16  }
  0x11   :  { %21 = dma.hbm_to_vmem [thread:$0]  %s1111_s0, 8192, %s16_s13, [#allocation3], %s864_s22, %s864_s22, %s865_s23  }
  0x12   :  { %859 = dma.done.wait [#allocation3], 8192  }
  0x13   :  { %860 = vsyncadd [#allocation3], 4294959104  ;;  %v866_v0 = vmov 0   ;;  %v95_v1 = vld [vmem:[%s1112_s1 + $0x10] sm:$0xff]  ;;  %v93_v2 = vld [vmem:[%s1112_s1] sm:$0xff]  ;;  %v351_v33 = vlaneseq  ;;  %vm716_vm0 = vcmask 7168  }
  0x14   :  { %814 = vset.pattern.permute.xlu1 %v866_v0  ;;  %813 = vset.pattern.permute.xlu0 %v866_v0  ;;  %v96_v3 = vld [vmem:[%s1112_s1 + $0x18] sm:$0xff]  ;;  %v94_v4 = vld [vmem:[%s1112_s1 + $0x8] sm:$0xff]  ;;  %v97_v6 = vld [vmem:[%s1112_s1 + $0x20] sm:$0xff] }
  0x15   :  { %138 = vperm.xlu1 %814, %v95_v1   ;;  %128 = vperm.xlu0 %813, %v93_v2   ;;  %v98_v5 = vld [vmem:[%s1112_s1 + $0x28] sm:$0xff]  ;;  %v100_v7 = vld [vmem:[%s1112_s1 + $0x38] sm:$0xff]  ;;  %v99_v8 = vld [vmem:[%s1112_s1 + $0x30] sm:$0xff]  ;;  %v352_v34 = vshrl.u32 %v351_v33, 7 }
  0x16   :  { %v102_v9 = vld [vmem:[%s1112_s1 + $0x48] sm:$0xff]  ;;  %v101_v10 = vld [vmem:[%s1112_s1 + $0x40] sm:$0xff]  ;;  %v104_v11 = vld [vmem:[%s1112_s1 + $0x58] sm:$0xff] }
  0x17   :  { %v103_v12 = vld [vmem:[%s1112_s1 + $0x50] sm:$0xff]  ;;  %v106_v13 = vld [vmem:[%s1112_s1 + $0x68] sm:$0xff]  ;;  %v105_v14 = vld [vmem:[%s1112_s1 + $0x60] sm:$0xff]  ;;  %v353_v35 = vsub.s32 0, %v352_v34  ;;  %v357_v36 = vsub.s32 1, %v352_v34 }
  0x18   :  { %v108_v15 = vld [vmem:[%s1112_s1 + $0x78] sm:$0xff]  ;;  %v107_v16 = vld [vmem:[%s1112_s1 + $0x70] sm:$0xff]  ;;  %v110_v17 = vld [vmem:[%s1112_s1 + $0x88] sm:$0xff] }
  0x19   :  { %143 = vperm.xlu1 %814, %v96_v3   ;;  %133 = vperm.xlu0 %813, %v94_v4   ;;  %v109_v18 = vld [vmem:[%s1112_s1 + $0x80] sm:$0xff]  ;;  %v112_v19 = vld [vmem:[%s1112_s1 + $0x98] sm:$0xff]  ;;  %v111_v20 = vld [vmem:[%s1112_s1 + $0x90] sm:$0xff] }
  0x1a   :  { %v114_v21 = vld [vmem:[%s1112_s1 + $0xa8] sm:$0xff]  ;;  %v113_v22 = vld [vmem:[%s1112_s1 + $0xa0] sm:$0xff]  ;;  %v116_v23 = vld [vmem:[%s1112_s1 + $0xb8] sm:$0xff] }
  0x1b   :  { %v115_v24 = vld [vmem:[%s1112_s1 + $0xb0] sm:$0xff]  ;;  %v118_v25 = vld [vmem:[%s1112_s1 + $0xc8] sm:$0xff]  ;;  %v117_v26 = vld [vmem:[%s1112_s1 + $0xc0] sm:$0xff] }
  0x1c   :  { %v120_v27 = vld [vmem:[%s1112_s1 + $0xd8] sm:$0xff]  ;;  %v119_v28 = vld [vmem:[%s1112_s1 + $0xd0] sm:$0xff]  ;;  %v122_v29 = vld [vmem:[%s1112_s1 + $0xe8] sm:$0xff] }
  0x1d   :  { %153 = vperm.xlu1 %814, %v98_v5   ;;  %148 = vperm.xlu0 %813, %v97_v6   ;;  %v121_v30 = vld [vmem:[%s1112_s1 + $0xe0] sm:$0xff]  ;;  %v124_v31 = vld [vmem:[%s1112_s1 + $0xf8] sm:$0xff]  ;;  %v123_v32 = vld [vmem:[%s1112_s1 + $0xf0] sm:$0xff]  ;;  %s867_s1 = smov [#allocation5]  }
  0x1e   :  { %v125_v37 = vld [vmem:[%s1113_s2] sm:$0x3]  ;;  %v30_v41 = vld [vmem:[#allocation2 + $0x8] sm:$0xff]  ;;  %v31_v50 = vld [vmem:[#allocation2 + $0x10] sm:$0xff]  ;;  %s797_s2 = sshll.u32 %s867_s1, 4  ;;  %s798_s2 = int_to_ptr.vmem [resolvable:$true] %s797_s2 }
  0x1f   :  { %v999_v38 = vrot.slane %v125_v37, %v353_v35  ;;  %v1001_v39 = vrot.slane %v125_v37, %v357_v36  ;;  %v29_v40 = vld [vmem:[#allocation2] sm:$0xff]  ;;  %v34_v43 = vld [vmem:[#allocation2 + $0x28] sm:$0xff]  ;;  %v32_v51 = vld [vmem:[#allocation2 + $0x18] sm:$0xff]  ;;  %s837_s9 = scalar_lea.vmem %s798_s2, 128  ;;  %p842_p9 = scmp.lt.s32.totalorder %s798_s2, %s798_s2 }
  0x20   :  { %v33_v42 = vld [vmem:[#allocation2 + $0x20] sm:$0xff]  ;;  %v35_v56 = vld [vmem:[#allocation2 + $0x30] sm:$0xff]  ;;  %v36_v57 = vld [vmem:[#allocation2 + $0x38] sm:$0xff]  ;;  %p838_p8 = scmp.ne.s32.totalorder %s798_s2, %s837_s9  ;;  %p843_p10 = scmp.lt.s32.totalorder %s837_s9, %s837_s9 }
  0x21   :  { %163 = vperm.xlu1 %814, %v100_v7   ;;  %158 = vperm.xlu0 %813, %v99_v8   ;;  %v361_v44 = vmax.f32 %v29_v40, %v999_v38  ;;  %v362_v45 = vmax.f32 %v30_v41, %v1001_v39  ;;  %v365_v47 = vmax.f32 %v33_v42, %v999_v38  ;;  %v37_v0 = vld [vmem:[#allocation2 + $0x40] sm:$0xff]  ;;  %v38_v1 = vld [vmem:[#allocation2 + $0x48] sm:$0xff]  ;;  %v39_v8 = vld [vmem:[#allocation2 + $0x50] sm:$0xff] }
  0x22   :  { %v366_v48 = vmax.f32 %v34_v43, %v1001_v39  ;;  %v363_v58 = vmax.f32 %v31_v50, %v999_v38  ;;  %v364_v59 = vmax.f32 %v32_v51, %v1001_v39  ;;  %v367_v5 = vmax.f32 %v35_v56, %v999_v38  ;;  %p844_p11 = por %p843_p10, %p842_p9 }
  0x24   :  { %p845_p12 = pnand %p844_p11, %p838_p8 }
  0x25   :  { %173 = vperm.xlu1 %814, %v102_v9   ;;  %168 = vperm.xlu0 %813, %v101_v10   ;;  %v368_v10 = vmax.f32 %v36_v57, %v1001_v39 }
  0x29   :  { %183 = vperm.xlu1 %814, %v104_v11   ;;  %178 = vperm.xlu0 %813, %v103_v12   ;;  %v40_v12 = vld [vmem:[#allocation2 + $0x58] sm:$0xff] }
  0x2d   :  { %193 = vperm.xlu1 %814, %v106_v13   ;;  %188 = vperm.xlu0 %813, %v105_v14   ;;  %v369_v13 = vmax.f32 %v37_v0, %v999_v38  ;;  %v370_v14 = vmax.f32 %v38_v1, %v1001_v39 }
  0x31   :  { %203 = vperm.xlu1 %814, %v108_v15   ;;  %198 = vperm.xlu0 %813, %v107_v16  }
  0x35   :  { %213 = vperm.xlu1 %814, %v110_v17   ;;  %208 = vperm.xlu0 %813, %v109_v18   ;;  %v371_v18 = vmax.f32 %v39_v8, %v999_v38 }
  0x39   :  { %223 = vperm.xlu1 %814, %v112_v19   ;;  %218 = vperm.xlu0 %813, %v111_v20  }
  0x3d   :  { %233 = vperm.xlu1 %814, %v114_v21   ;;  %228 = vperm.xlu0 %813, %v113_v22   ;;  %v41_v21 = vld [vmem:[#allocation2 + $0x60] sm:$0xff]  ;;  %v42_v22 = vld [vmem:[#allocation2 + $0x68] sm:$0xff] }
  0x3e   :  { %v373_v33 = vmax.f32 %v41_v21, %v999_v38  ;;  %v374_v34 = vmax.f32 %v42_v22, %v1001_v39 }
  0x41   :  { %243 = vperm.xlu1 %814, %v116_v23   ;;  %238 = vperm.xlu0 %813, %v115_v24   ;;  %v372_v23 = vmax.f32 %v40_v12, %v1001_v39 }
  0x45   :  { %253 = vperm.xlu1 %814, %v118_v25   ;;  %248 = vperm.xlu0 %813, %v117_v26   ;;  %v43_v26 = vld [vmem:[#allocation2 + $0x70] sm:$0xff] }
  0x49   :  { %263 = vperm.xlu1 %814, %v120_v27   ;;  %258 = vperm.xlu0 %813, %v119_v28   ;;  %v44_v27 = vld [vmem:[#allocation2 + $0x78] sm:$0xff] }
  0x4d   :  { %273 = vperm.xlu1 %814, %v122_v29   ;;  %268 = vperm.xlu0 %813, %v121_v30  }
  0x51   :  { %283 = vperm.xlu1 %814, %v124_v31   ;;  %278 = vperm.xlu0 %813, %v123_v32  }
  0x94   :  { %v139_v46 = vpop.permute.xlu1 %138  ;;  %v129_v49 = vpop.permute.xlu0 %128 }
  0x95   :  { %v290_v52 = vmax.f32 %v33_v42, %v139_v46  ;;  %v291_v53 = vmax.f32 %v34_v43, %v139_v46  ;;  %v286_v54 = vmax.f32 %v29_v40, %v129_v49  ;;  %v287_v55 = vmax.f32 %v30_v41, %v129_v49  ;;  %v45_v43 = vld [vmem:[#allocation2 + $0x80] sm:$0xff]  ;;  %v47_v49 = vld [vmem:[#allocation2 + $0x90] sm:$0xff] }
  0x96   :  { %v375_v40 = vmax.f32 %v43_v26, %v999_v38  ;;  %v376_v41 = vmax.f32 %v44_v27, %v1001_v39 }
  0x97   :  { %v425_v60 = vadd.f32 %v361_v44, %v286_v54  ;;  %v426_v61 = vadd.f32 %v362_v45, %v287_v55  ;;  %v429_v2 = vadd.f32 %v365_v47, %v290_v52  ;;  %v430_v3 = vadd.f32 %v366_v48, %v291_v53  ;;  %v46_v44 = vld [vmem:[#allocation2 + $0x88] sm:$0xff]  ;;  %v48_v54 = vld [vmem:[#allocation2 + $0x98] sm:$0xff] }
  0x98   :  { %v144_v62 = vpop.permute.xlu1 %143  ;;  %v134_v63 = vpop.permute.xlu0 %133  ;;  %v377_v55 = vmax.f32 %v45_v43, %v999_v38 }
  0x99   :  { %v292_v4 = vmax.f32 %v35_v56, %v144_v62  ;;  %v288_v6 = vmax.f32 %v31_v50, %v134_v63  ;;  %v289_v7 = vmax.f32 %v32_v51, %v134_v63  ;;  %v293_v9 = vmax.f32 %v36_v57, %v144_v62  ;;  %v49_v62 = vld [vmem:[#allocation2 + $0xa0] sm:$0xff]  ;;  %v50_v63 = vld [vmem:[#allocation2 + $0xa8] sm:$0xff] }
  0x9a   :  { %v489_v11 = vadd.f32 %v426_v61, %v425_v60  ;;  %v495_v20 = vadd.f32 %v430_v3, %v429_v2  ;;  %v378_v56 = vmax.f32 %v46_v44, %v1001_v39  ;;  %v379_v60 = vmax.f32 %v47_v49, %v999_v38 }
  0x9b   :  { %v427_v15 = vadd.f32 %v363_v58, %v288_v6  ;;  %v428_v16 = vadd.f32 %v364_v59, %v289_v7  ;;  %v431_v28 = vadd.f32 %v367_v5, %v292_v4  ;;  %v432_v32 = vadd.f32 %v368_v10, %v293_v9  ;;  %v51_v4 = vld [vmem:[#allocation2 + $0xb0] sm:$0xff]  ;;  %v52_v5 = vld [vmem:[#allocation2 + $0xb8] sm:$0xff] }
  0x9c   :  { %490 = vadd.xlane.f32.xlu0 %v489_v11  ;;  %v154_v17 = vpop.permute.xlu1 %153  ;;  %v149_v19 = vpop.permute.xlu0 %148  ;;  %v381_v11 = vmax.f32 %v49_v62, %v999_v38 }
  0x9d   :  { %v294_v24 = vmax.f32 %v37_v0, %v149_v19  ;;  %v295_v25 = vmax.f32 %v38_v1, %v149_v19  ;;  %v296_v29 = vmax.f32 %v39_v8, %v154_v17  ;;  %v297_v30 = vmax.f32 %v40_v12, %v154_v17  ;;  %v53_v19 = vld [vmem:[#allocation2 + $0xc0] sm:$0xff] }
  0x9e   :  { %v492_v31 = vadd.f32 %v428_v16, %v427_v15  ;;  %v498_v51 = vadd.f32 %v432_v32, %v431_v28  ;;  %v380_v8 = vmax.f32 %v48_v54, %v1001_v39  ;;  %v382_v12 = vmax.f32 %v50_v63, %v1001_v39 }
  0x9f   :  { %v433_v35 = vadd.f32 %v369_v13, %v294_v24  ;;  %v434_v36 = vadd.f32 %v370_v14, %v295_v25  ;;  %v435_v52 = vadd.f32 %v371_v18, %v296_v29  ;;  %v436_v53 = vadd.f32 %v372_v23, %v297_v30  ;;  %v55_v24 = vld [vmem:[#allocation2 + $0xd0] sm:$0xff]  ;;  %v56_v25 = vld [vmem:[#allocation2 + $0xd8] sm:$0xff] }
  0xa0   :  { %493 = vadd.xlane.f32.xlu1 %v492_v31  ;;  %496 = vadd.xlane.f32.xlu0 %v495_v20  ;;  %v164_v37 = vpop.permute.xlu1 %163  ;;  %v159_v42 = vpop.permute.xlu0 %158  ;;  %v383_v16 = vmax.f32 %v51_v4, %v999_v38  ;;  %v384_v17 = vmax.f32 %v52_v5, %v1001_v39  ;;  %v54_v20 = vld [vmem:[#allocation2 + $0xc8] sm:$0xff]  ;;  %v385_v31 = vmax.f32 %v53_v19, %v999_v38 }
  0xa1   :  { %v300_v45 = vmax.f32 %v43_v26, %v164_v37  ;;  %v301_v46 = vmax.f32 %v44_v27, %v164_v37  ;;  %v298_v47 = vmax.f32 %v41_v21, %v159_v42  ;;  %v299_v48 = vmax.f32 %v42_v22, %v159_v42  ;;  %v58_v42 = vld [vmem:[#allocation2 + $0xe8] sm:$0xff] }
  0xa2   :  { %v501_v50 = vadd.f32 %v434_v36, %v433_v35  ;;  %v504_v10 = vadd.f32 %v436_v53, %v435_v52  ;;  %v386_v32 = vmax.f32 %v54_v20, %v1001_v39  ;;  %v387_v36 = vmax.f32 %v55_v24, %v999_v38  ;;  %v60_v52 = vld [vmem:[#allocation2 + $0xf8] sm:$0xff] }
  0xa3   :  { %v437_v57 = vadd.f32 %v373_v33, %v298_v47  ;;  %v438_v58 = vadd.f32 %v374_v34, %v299_v48  ;;  %v439_v0 = vadd.f32 %v375_v40, %v300_v45  ;;  %v440_v6 = vadd.f32 %v376_v41, %v301_v46  ;;  %v57_v41 = vld [vmem:[#allocation2 + $0xe0] sm:$0xff]  ;;  %v59_v47 = vld [vmem:[#allocation2 + $0xf0] sm:$0xff] }
  0xa4   :  { %502 = vadd.xlane.f32.xlu1 %v501_v50  ;;  %499 = vadd.xlane.f32.xlu0 %v498_v51  ;;  %v174_v59 = vpop.permute.xlu1 %173  ;;  %v169_v61 = vpop.permute.xlu0 %168  ;;  %v388_v37 = vmax.f32 %v56_v25, %v1001_v39  ;;  %v389_v53 = vmax.f32 %v57_v41, %v999_v38 }
  0xa5   :  { %v304_v1 = vmax.f32 %v47_v49, %v174_v59  ;;  %v302_v2 = vmax.f32 %v45_v43, %v169_v61  ;;  %v303_v3 = vmax.f32 %v46_v44, %v169_v61  ;;  %v305_v7 = vmax.f32 %v48_v54, %v174_v59  ;;  %v62_v61 = vld [vmem:[#allocation2 + $0x108] sm:$0xff] }
  0xa6   :  { %v507_v9 = vadd.f32 %v438_v58, %v437_v57  ;;  %v510_v23 = vadd.f32 %v440_v6, %v439_v0  ;;  %v390_v54 = vmax.f32 %v58_v42, %v1001_v39  ;;  %v391_v58 = vmax.f32 %v59_v47, %v999_v38 }
  0xa7   :  { %v441_v13 = vadd.f32 %v377_v55, %v302_v2  ;;  %v442_v14 = vadd.f32 %v378_v56, %v303_v3  ;;  %v443_v26 = vadd.f32 %v379_v60, %v304_v1  ;;  %v444_v30 = vadd.f32 %v380_v8, %v305_v7  ;;  %v61_v60 = vld [vmem:[#allocation2 + $0x100] sm:$0xff]  ;;  %v63_v2 = vld [vmem:[#allocation2 + $0x110] sm:$0xff]  ;;  %v64_v3 = vld [vmem:[#allocation2 + $0x118] sm:$0xff] }
  0xa8   :  { %508 = vadd.xlane.f32.xlu1 %v507_v9  ;;  %505 = vadd.xlane.f32.xlu0 %v504_v10  ;;  %v184_v15 = vpop.permute.xlu1 %183  ;;  %v179_v18 = vpop.permute.xlu0 %178  ;;  %v392_v6 = vmax.f32 %v60_v52, %v1001_v39  ;;  %v393_v9 = vmax.f32 %v61_v60, %v999_v38  ;;  %v394_v10 = vmax.f32 %v62_v61, %v1001_v39 }
  0xa9   :  { %v306_v21 = vmax.f32 %v49_v62, %v179_v18  ;;  %v307_v22 = vmax.f32 %v50_v63, %v179_v18  ;;  %v308_v27 = vmax.f32 %v51_v4, %v184_v15  ;;  %v309_v28 = vmax.f32 %v52_v5, %v184_v15  ;;  %v66_v18 = vld [vmem:[#allocation2 + $0x128] sm:$0xff] }
  0xaa   :  { %v513_v29 = vadd.f32 %v442_v14, %v441_v13  ;;  %v516_v49 = vadd.f32 %v444_v30, %v443_v26  ;;  %v395_v14 = vmax.f32 %v63_v2, %v999_v38  ;;  %v396_v15 = vmax.f32 %v64_v3, %v1001_v39 }
  0xab   :  { %v445_v33 = vadd.f32 %v381_v11, %v306_v21  ;;  %v446_v34 = vadd.f32 %v382_v12, %v307_v22  ;;  %v447_v50 = vadd.f32 %v383_v16, %v308_v27  ;;  %v448_v51 = vadd.f32 %v384_v17, %v309_v28  ;;  %v65_v17 = vld [vmem:[#allocation2 + $0x120] sm:$0xff]  ;;  %v67_v22 = vld [vmem:[#allocation2 + $0x130] sm:$0xff] }
  0xac   :  { %514 = vadd.xlane.f32.xlu1 %v513_v29  ;;  %511 = vadd.xlane.f32.xlu0 %v510_v23  ;;  %v194_v35 = vpop.permute.xlu1 %193  ;;  %v189_v40 = vpop.permute.xlu0 %188  ;;  %v68_v23 = vld [vmem:[#allocation2 + $0x138] sm:$0xff]  ;;  %v397_v29 = vmax.f32 %v65_v17, %v999_v38  ;;  %v398_v30 = vmax.f32 %v66_v18, %v1001_v39 }
  0xad   :  { %v312_v43 = vmax.f32 %v55_v24, %v194_v35  ;;  %v313_v44 = vmax.f32 %v56_v25, %v194_v35  ;;  %v310_v45 = vmax.f32 %v53_v19, %v189_v40  ;;  %v311_v46 = vmax.f32 %v54_v20, %v189_v40  ;;  %v70_v40 = vld [vmem:[#allocation2 + $0x148] sm:$0xff] }
  0xae   :  { %v519_v48 = vadd.f32 %v446_v34, %v445_v33  ;;  %v522_v8 = vadd.f32 %v448_v51, %v447_v50  ;;  %v399_v34 = vmax.f32 %v67_v22, %v999_v38  ;;  %v400_v35 = vmax.f32 %v68_v23, %v1001_v39  ;;  %v72_v50 = vld [vmem:[#allocation2 + $0x158] sm:$0xff] }
  0xaf   :  { %v449_v55 = vadd.f32 %v385_v31, %v310_v45  ;;  %v450_v56 = vadd.f32 %v386_v32, %v311_v46  ;;  %v451_v62 = vadd.f32 %v387_v36, %v312_v43  ;;  %v452_v4 = vadd.f32 %v388_v37, %v313_v44  ;;  %v69_v37 = vld [vmem:[#allocation2 + $0x140] sm:$0xff]  ;;  %v71_v45 = vld [vmem:[#allocation2 + $0x150] sm:$0xff] }
  0xb0   :  { %520 = vadd.xlane.f32.xlu1 %v519_v48  ;;  %517 = vadd.xlane.f32.xlu0 %v516_v49  ;;  %v204_v57 = vpop.permute.xlu1 %203  ;;  %v199_v59 = vpop.permute.xlu0 %198  ;;  %v401_v51 = vmax.f32 %v69_v37, %v999_v38 }
  0xb1   :  { %v316_v63 = vmax.f32 %v59_v47, %v204_v57  ;;  %v314_v0 = vmax.f32 %v57_v41, %v199_v59  ;;  %v315_v1 = vmax.f32 %v58_v42, %v199_v59  ;;  %v317_v5 = vmax.f32 %v60_v52, %v204_v57  ;;  %v74_v59 = vld [vmem:[#allocation2 + $0x168] sm:$0xff] }
  0xb2   :  { %v525_v7 = vadd.f32 %v450_v56, %v449_v55  ;;  %v528_v21 = vadd.f32 %v452_v4, %v451_v62  ;;  %v402_v52 = vmax.f32 %v70_v40, %v1001_v39  ;;  %v403_v56 = vmax.f32 %v71_v45, %v999_v38 }
  0xb3   :  { %v453_v11 = vadd.f32 %v389_v53, %v314_v0  ;;  %v454_v12 = vadd.f32 %v390_v54, %v315_v1  ;;  %v455_v24 = vadd.f32 %v391_v58, %v316_v63  ;;  %v456_v28 = vadd.f32 %v392_v6, %v317_v5  ;;  %v73_v58 = vld [vmem:[#allocation2 + $0x160] sm:$0xff]  ;;  %v75_v0 = vld [vmem:[#allocation2 + $0x170] sm:$0xff]  ;;  %v76_v1 = vld [vmem:[#allocation2 + $0x178] sm:$0xff] }
  0xb4   :  { %526 = vadd.xlane.f32.xlu1 %v525_v7  ;;  %523 = vadd.xlane.f32.xlu0 %v522_v8  ;;  %v214_v13 = vpop.permute.xlu1 %213  ;;  %v209_v16 = vpop.permute.xlu0 %208  ;;  %v404_v4 = vmax.f32 %v72_v50, %v1001_v39  ;;  %v405_v7 = vmax.f32 %v73_v58, %v999_v38  ;;  %v406_v8 = vmax.f32 %v74_v59, %v1001_v39 }
  0xb5   :  { %v318_v19 = vmax.f32 %v61_v60, %v209_v16  ;;  %v319_v20 = vmax.f32 %v62_v61, %v209_v16  ;;  %v320_v25 = vmax.f32 %v63_v2, %v214_v13  ;;  %v321_v26 = vmax.f32 %v64_v3, %v214_v13  ;;  %v78_v16 = vld [vmem:[#allocation2 + $0x188] sm:$0xff] }
  0xb6   :  { %v531_v27 = vadd.f32 %v454_v12, %v453_v11  ;;  %v534_v47 = vadd.f32 %v456_v28, %v455_v24  ;;  %v407_v12 = vmax.f32 %v75_v0, %v999_v38  ;;  %v408_v13 = vmax.f32 %v76_v1, %v1001_v39 }
  0xb7   :  { %v457_v31 = vadd.f32 %v393_v9, %v318_v19  ;;  %v458_v32 = vadd.f32 %v394_v10, %v319_v20  ;;  %v459_v48 = vadd.f32 %v395_v14, %v320_v25  ;;  %v460_v49 = vadd.f32 %v396_v15, %v321_v26  ;;  %v77_v15 = vld [vmem:[#allocation2 + $0x180] sm:$0xff]  ;;  %v79_v20 = vld [vmem:[#allocation2 + $0x190] sm:$0xff] }
  0xb8   :  { %532 = vadd.xlane.f32.xlu1 %v531_v27  ;;  %529 = vadd.xlane.f32.xlu0 %v528_v21  ;;  %v224_v33 = vpop.permute.xlu1 %223  ;;  %v219_v36 = vpop.permute.xlu0 %218  ;;  %v80_v21 = vld [vmem:[#allocation2 + $0x198] sm:$0xff]  ;;  %v409_v27 = vmax.f32 %v77_v15, %v999_v38  ;;  %v410_v28 = vmax.f32 %v78_v16, %v1001_v39 }
  0xb9   :  { %v324_v41 = vmax.f32 %v67_v22, %v224_v33  ;;  %v325_v42 = vmax.f32 %v68_v23, %v224_v33  ;;  %v322_v43 = vmax.f32 %v65_v17, %v219_v36  ;;  %v323_v44 = vmax.f32 %v66_v18, %v219_v36  ;;  %v82_v36 = vld [vmem:[#allocation2 + $0x1a8] sm:$0xff] }
  0xba   :  { %v537_v46 = vadd.f32 %v458_v32, %v457_v31  ;;  %v540_v6 = vadd.f32 %v460_v49, %v459_v48  ;;  %v411_v32 = vmax.f32 %v79_v20, %v999_v38  ;;  %v412_v33 = vmax.f32 %v80_v21, %v1001_v39 }
  0xbb   :  { %v461_v53 = vadd.f32 %v397_v29, %v322_v43  ;;  %v462_v54 = vadd.f32 %v398_v30, %v323_v44  ;;  %v463_v60 = vadd.f32 %v399_v34, %v324_v41  ;;  %v464_v2 = vadd.f32 %v400_v35, %v325_v42  ;;  %v81_v35 = vld [vmem:[#allocation2 + $0x1a0] sm:$0xff]  ;;  %v83_v43 = vld [vmem:[#allocation2 + $0x1b0] sm:$0xff]  ;;  %v84_v44 = vld [vmem:[#allocation2 + $0x1b8] sm:$0xff] }
  0xbc   :  { %538 = vadd.xlane.f32.xlu1 %v537_v46  ;;  %535 = vadd.xlane.f32.xlu0 %v534_v47  ;;  %v234_v55 = vpop.permute.xlu1 %233  ;;  %v229_v57 = vpop.permute.xlu0 %228  ;;  %v413_v49 = vmax.f32 %v81_v35, %v999_v38 }
  0xbd   :  { %v328_v61 = vmax.f32 %v71_v45, %v234_v55  ;;  %v326_v62 = vmax.f32 %v69_v37, %v229_v57  ;;  %v327_v63 = vmax.f32 %v70_v40, %v229_v57  ;;  %v329_v3 = vmax.f32 %v72_v50, %v234_v55 }
  0xbe   :  { %v543_v5 = vadd.f32 %v462_v54, %v461_v53  ;;  %v546_v19 = vadd.f32 %v464_v2, %v463_v60  ;;  %v414_v50 = vmax.f32 %v82_v36, %v1001_v39  ;;  %v87_v53 = vld [vmem:[#allocation2 + $0x1d0] sm:$0xff]  ;;  %v415_v55 = vmax.f32 %v83_v43, %v999_v38 }
  0xbf   :  { %v465_v9 = vadd.f32 %v401_v51, %v326_v62  ;;  %v466_v10 = vadd.f32 %v402_v52, %v327_v63  ;;  %v467_v22 = vadd.f32 %v403_v56, %v328_v61  ;;  %v468_v26 = vadd.f32 %v404_v4, %v329_v3  ;;  %v91_v2 = vld [vmem:[#allocation2 + $0x1f0] sm:$0xff]  ;;  %v92_v3 = vld [vmem:[#allocation2 + $0x1f8] sm:$0xff] }
  0xc0   :  { %544 = vadd.xlane.f32.xlu1 %v543_v5  ;;  %541 = vadd.xlane.f32.xlu0 %v540_v6  ;;  %v244_v11 = vpop.permute.xlu1 %243  ;;  %v239_v14 = vpop.permute.xlu0 %238  ;;  %v416_v56 = vmax.f32 %v84_v44, %v1001_v39 }
  0xc1   :  { %v330_v17 = vmax.f32 %v73_v58, %v239_v14  ;;  %v331_v18 = vmax.f32 %v74_v59, %v239_v14  ;;  %v332_v23 = vmax.f32 %v75_v0, %v244_v11  ;;  %v333_v24 = vmax.f32 %v76_v1, %v244_v11  ;;  %v85_v58 = vld [vmem:[#allocation2 + $0x1c0] sm:$0xff]  ;;  %v86_v59 = vld [vmem:[#allocation2 + $0x1c8] sm:$0xff]  ;;  %v88_v0 = vld [vmem:[#allocation2 + $0x1d8] sm:$0xff] }
  0xc2   :  { %v549_v25 = vadd.f32 %v466_v10, %v465_v9  ;;  %v552_v46 = vadd.f32 %v468_v26, %v467_v22  ;;  %v418_v9 = vmax.f32 %v86_v59, %v1001_v39 }
  0xc3   :  { %v469_v29 = vadd.f32 %v405_v7, %v330_v17  ;;  %v470_v30 = vadd.f32 %v406_v8, %v331_v18  ;;  %v471_v47 = vadd.f32 %v407_v12, %v332_v23  ;;  %v472_v48 = vadd.f32 %v408_v13, %v333_v24  ;;  %v89_v17 = vld [vmem:[#allocation2 + $0x1e0] sm:$0xff]  ;;  %v90_v18 = vld [vmem:[#allocation2 + $0x1e8] sm:$0xff] }
  0xc4   :  { %550 = vadd.xlane.f32.xlu1 %v549_v25  ;;  %547 = vadd.xlane.f32.xlu0 %v546_v19  ;;  %v254_v31 = vpop.permute.xlu1 %253  ;;  %v249_v34 = vpop.permute.xlu0 %248  ;;  %v419_v7 = vmax.f32 %v87_v53, %v999_v38  ;;  %v417_v8 = vmax.f32 %v85_v58, %v999_v38  ;;  %v420_v13 = vmax.f32 %v88_v0, %v1001_v39 }
  0xc5   :  { %v336_v37 = vmax.f32 %v79_v20, %v254_v31  ;;  %v337_v40 = vmax.f32 %v80_v21, %v254_v31  ;;  %v334_v41 = vmax.f32 %v77_v15, %v249_v34  ;;  %v335_v42 = vmax.f32 %v78_v16, %v249_v34 }
  0xc6   :  { %v555_v45 = vadd.f32 %v470_v30, %v469_v29  ;;  %v558_v6 = vadd.f32 %v472_v48, %v471_v47  ;;  %v423_v15 = vmax.f32 %v91_v2, %v999_v38  ;;  %v424_v16 = vmax.f32 %v92_v3, %v1001_v39 }
  0xc7   :  { %v473_v51 = vadd.f32 %v409_v27, %v334_v41  ;;  %v474_v52 = vadd.f32 %v410_v28, %v335_v42  ;;  %v475_v60 = vadd.f32 %v411_v32, %v336_v37  ;;  %v476_v1 = vadd.f32 %v412_v33, %v337_v40 }
  0xc8   :  { %556 = vadd.xlane.f32.xlu1 %v555_v45  ;;  %553 = vadd.xlane.f32.xlu0 %v552_v46  ;;  %v264_v54 = vpop.permute.xlu1 %263  ;;  %v259_v57 = vpop.permute.xlu0 %258  ;;  %v421_v27 = vmax.f32 %v89_v17, %v999_v38  ;;  %v422_v28 = vmax.f32 %v90_v18, %v1001_v39 }
  0xc9   :  { %v340_v61 = vmax.f32 %v83_v43, %v264_v54  ;;  %v338_v62 = vmax.f32 %v81_v35, %v259_v57  ;;  %v339_v63 = vmax.f32 %v82_v36, %v259_v57  ;;  %v341_v4 = vmax.f32 %v84_v44, %v264_v54 }
  0xca   :  { %v561_v5 = vadd.f32 %v474_v52, %v473_v51  ;;  %v564_v21 = vadd.f32 %v476_v1, %v475_v60 }
  0xcb   :  { %v477_v10 = vadd.f32 %v413_v49, %v338_v62  ;;  %v478_v11 = vadd.f32 %v414_v50, %v339_v63  ;;  %v479_v22 = vadd.f32 %v415_v55, %v340_v61  ;;  %v480_v26 = vadd.f32 %v416_v56, %v341_v4 }
  0xcc   :  { %562 = vadd.xlane.f32.xlu1 %v561_v5  ;;  %559 = vadd.xlane.f32.xlu0 %v558_v6  ;;  %v274_v12 = vpop.permute.xlu1 %273  ;;  %v269_v14 = vpop.permute.xlu0 %268 }
  0xcd   :  { %v342_v19 = vmax.f32 %v85_v58, %v269_v14  ;;  %v343_v20 = vmax.f32 %v86_v59, %v269_v14  ;;  %v344_v23 = vmax.f32 %v87_v53, %v274_v12  ;;  %v345_v24 = vmax.f32 %v88_v0, %v274_v12 }
  0xce   :  { %v567_v25 = vadd.f32 %v478_v11, %v477_v10  ;;  %v570_v40 = vadd.f32 %v480_v26, %v479_v22 }
  0xcf   :  { %v481_v29 = vadd.f32 %v417_v8, %v342_v19  ;;  %v482_v30 = vadd.f32 %v418_v9, %v343_v20  ;;  %v483_v41 = vadd.f32 %v419_v7, %v344_v23  ;;  %v484_v42 = vadd.f32 %v420_v13, %v345_v24 }
  0xd0   :  { %568 = vadd.xlane.f32.xlu1 %v567_v25  ;;  %565 = vadd.xlane.f32.xlu0 %v564_v21  ;;  %v284_v31 = vpop.permute.xlu1 %283  ;;  %v279_v32 = vpop.permute.xlu0 %278 }
  0xd1   :  { %v348_v33 = vmax.f32 %v91_v2, %v284_v31  ;;  %v349_v34 = vmax.f32 %v92_v3, %v284_v31  ;;  %v346_v35 = vmax.f32 %v89_v17, %v279_v32  ;;  %v347_v36 = vmax.f32 %v90_v18, %v279_v32 }
  0xd2   :  { %v573_v37 = vadd.f32 %v482_v30, %v481_v29  ;;  %v576_v47 = vadd.f32 %v484_v42, %v483_v41 }
  0xd3   :  { %v485_v43 = vadd.f32 %v421_v27, %v346_v35  ;;  %v486_v44 = vadd.f32 %v422_v28, %v347_v36  ;;  %v487_v45 = vadd.f32 %v423_v15, %v348_v33  ;;  %v488_v38 = vadd.f32 %v424_v16, %v349_v34 }
  0xd4   :  { %574 = vadd.xlane.f32.xlu1 %v573_v37  ;;  %571 = vadd.xlane.f32.xlu0 %v570_v40 }
  0xd5   :  { %v579_v39 = vadd.f32 %v486_v44, %v485_v43  ;;  %v582_v46 = vadd.f32 %v488_v38, %v487_v45 }
  0xd8   :  { %580 = vadd.xlane.f32.xlu1 %v579_v39  ;;  %577 = vadd.xlane.f32.xlu0 %v576_v47 }
  0xdc   :  { %583 = vadd.xlane.f32.xlu0 %v582_v46 }
 0x129   :  { %v491_v48 = vpop.xlane.xlu0 %490 }
 0x12a   :  { %v717_v51 = vsel %vm716_vm0, %v491_v48, 0.0 }
 0x12d   :  { %v494_v49 = vpop.xlane.xlu1 %493  ;;  %v497_v50 = vpop.xlane.xlu0 %496 }
 0x12e   :  { %v718_v52 = vsel %vm716_vm0, %v494_v49, 0.0  ;;  %v720_v54 = vsel %vm716_vm0, %v497_v50, 0.0 }
 0x12f   :  { %v719_v53 = vadd.f32 %v718_v52, %v717_v51 }
 0x131   :  { %v721_v55 = vadd.f32 %v720_v54, %v719_v53  ;;  %v503_v56 = vpop.xlane.xlu1 %502  ;;  %v500_v57 = vpop.xlane.xlu0 %499 }
 0x132   :  { %v722_v58 = vsel %vm716_vm0, %v500_v57, 0.0  ;;  %v724_v60 = vsel %vm716_vm0, %v503_v56, 0.0 }
 0x133   :  { %v723_v59 = vadd.f32 %v722_v58, %v721_v55 }
 0x135   :  { %v509_v61 = vpop.xlane.xlu1 %508  ;;  %v725_v62 = vadd.f32 %v724_v60, %v723_v59  ;;  %v506_v63 = vpop.xlane.xlu0 %505 }
 0x136   :  { %v726_v0 = vsel %vm716_vm0, %v506_v63, 0.0  ;;  %v728_v2 = vsel %vm716_vm0, %v509_v61, 0.0 }
 0x137   :  { %v727_v1 = vadd.f32 %v726_v0, %v725_v62 }
 0x139   :  { %v515_v3 = vpop.xlane.xlu1 %514  ;;  %v729_v4 = vadd.f32 %v728_v2, %v727_v1  ;;  %v512_v5 = vpop.xlane.xlu0 %511 }
 0x13a   :  { %v730_v6 = vsel %vm716_vm0, %v512_v5, 0.0  ;;  %v732_v8 = vsel %vm716_vm0, %v515_v3, 0.0 }
 0x13b   :  { %v731_v7 = vadd.f32 %v730_v6, %v729_v4 }
 0x13d   :  { %v521_v9 = vpop.xlane.xlu1 %520  ;;  %v733_v10 = vadd.f32 %v732_v8, %v731_v7  ;;  %v518_v11 = vpop.xlane.xlu0 %517 }
 0x13e   :  { %v734_v12 = vsel %vm716_vm0, %v518_v11, 0.0  ;;  %v736_v14 = vsel %vm716_vm0, %v521_v9, 0.0 }
 0x13f   :  { %v735_v13 = vadd.f32 %v734_v12, %v733_v10 }
 0x141   :  { %v527_v15 = vpop.xlane.xlu1 %526  ;;  %v737_v16 = vadd.f32 %v736_v14, %v735_v13  ;;  %v524_v17 = vpop.xlane.xlu0 %523 }
 0x142   :  { %v738_v18 = vsel %vm716_vm0, %v524_v17, 0.0  ;;  %v740_v20 = vsel %vm716_vm0, %v527_v15, 0.0 }
 0x143   :  { %v739_v19 = vadd.f32 %v738_v18, %v737_v16 }
 0x145   :  { %v533_v21 = vpop.xlane.xlu1 %532  ;;  %v741_v22 = vadd.f32 %v740_v20, %v739_v19  ;;  %v530_v23 = vpop.xlane.xlu0 %529 }
 0x146   :  { %v742_v24 = vsel %vm716_vm0, %v530_v23, 0.0  ;;  %v744_v26 = vsel %vm716_vm0, %v533_v21, 0.0 }
 0x147   :  { %v743_v25 = vadd.f32 %v742_v24, %v741_v22 }
 0x149   :  { %v539_v27 = vpop.xlane.xlu1 %538  ;;  %v745_v28 = vadd.f32 %v744_v26, %v743_v25  ;;  %v536_v29 = vpop.xlane.xlu0 %535 }
 0x14a   :  { %v746_v30 = vsel %vm716_vm0, %v536_v29, 0.0  ;;  %v748_v32 = vsel %vm716_vm0, %v539_v27, 0.0 }
 0x14b   :  { %v747_v31 = vadd.f32 %v746_v30, %v745_v28 }
 0x14d   :  { %v545_v33 = vpop.xlane.xlu1 %544  ;;  %v749_v34 = vadd.f32 %v748_v32, %v747_v31  ;;  %v542_v35 = vpop.xlane.xlu0 %541 }
 0x14e   :  { %v750_v36 = vsel %vm716_vm0, %v542_v35, 0.0  ;;  %v752_v40 = vsel %vm716_vm0, %v545_v33, 0.0 }
 0x14f   :  { %v751_v37 = vadd.f32 %v750_v36, %v749_v34 }
 0x151   :  { %v551_v41 = vpop.xlane.xlu1 %550  ;;  %v753_v42 = vadd.f32 %v752_v40, %v751_v37  ;;  %v548_v43 = vpop.xlane.xlu0 %547 }
 0x152   :  { %v754_v44 = vsel %vm716_vm0, %v548_v43, 0.0  ;;  %v756_v38 = vsel %vm716_vm0, %v551_v41, 0.0 }
 0x153   :  { %v755_v45 = vadd.f32 %v754_v44, %v753_v42 }
 0x155   :  { %v557_v39 = vpop.xlane.xlu1 %556  ;;  %v757_v46 = vadd.f32 %v756_v38, %v755_v45  ;;  %v554_v47 = vpop.xlane.xlu0 %553 }
 0x156   :  { %v758_v48 = vsel %vm716_vm0, %v554_v47, 0.0  ;;  %v760_v50 = vsel %vm716_vm0, %v557_v39, 0.0 }
 0x157   :  { %v759_v49 = vadd.f32 %v758_v48, %v757_v46 }
 0x159   :  { %v563_v51 = vpop.xlane.xlu1 %562  ;;  %v761_v52 = vadd.f32 %v760_v50, %v759_v49  ;;  %v560_v53 = vpop.xlane.xlu0 %559 }
 0x15a   :  { %v762_v54 = vsel %vm716_vm0, %v560_v53, 0.0  ;;  %v764_v56 = vsel %vm716_vm0, %v563_v51, 0.0 }
 0x15b   :  { %v763_v55 = vadd.f32 %v762_v54, %v761_v52 }
 0x15d   :  { %v569_v57 = vpop.xlane.xlu1 %568  ;;  %v765_v58 = vadd.f32 %v764_v56, %v763_v55  ;;  %v566_v59 = vpop.xlane.xlu0 %565 }
 0x15e   :  { %v766_v60 = vsel %vm716_vm0, %v566_v59, 0.0  ;;  %v768_v62 = vsel %vm716_vm0, %v569_v57, 0.0 }
 0x15f   :  { %v767_v61 = vadd.f32 %v766_v60, %v765_v58 }
 0x161   :  { %v575_v63 = vpop.xlane.xlu1 %574  ;;  %v769_v0 = vadd.f32 %v768_v62, %v767_v61  ;;  %v572_v1 = vpop.xlane.xlu0 %571 }
 0x162   :  { %v770_v2 = vsel %vm716_vm0, %v572_v1, 0.0  ;;  %v772_v4 = vsel %vm716_vm0, %v575_v63, 0.0 }
 0x163   :  { %v771_v3 = vadd.f32 %v770_v2, %v769_v0 }
 0x165   :  { %v581_v5 = vpop.xlane.xlu1 %580  ;;  %v773_v6 = vadd.f32 %v772_v4, %v771_v3  ;;  %v578_v7 = vpop.xlane.xlu0 %577 }
 0x166   :  { %v774_v8 = vsel %vm716_vm0, %v578_v7, 0.0  ;;  %v776_v10 = vsel %vm716_vm0, %v581_v5, 0.0 }
 0x167   :  { %v775_v9 = vadd.f32 %v774_v8, %v773_v6 }
 0x169   :  { %v584_v11 = vpop.xlane.xlu0 %583  ;;  %v777_v12 = vadd.f32 %v776_v10, %v775_v9 }
 0x16a   :  { %v778_v13 = vsel %vm716_vm0, %v584_v11, 0.0 }
 0x16b   :  { %v779_v14 = vadd.f32 %v778_v13, %v777_v12 }
 0x16d   :  { %780 = vadd.xlane.f32.xlu1 %v779_v14 }
 0x1fa   :  { %v781_v15 = vpop.xlane.xlu1 %780 }
 0x1fb   :  { %v782_v16 = vrot.slane %v781_v15, 4 }
 0x1fd   :  { %v783_v17 = vadd.f32 %v782_v16, %v781_v15 }
 0x1ff   :  { %v784_v18 = vrot.slane %v783_v17, 2 }
 0x201   :  { %v785_v19 = vadd.f32 %v784_v18, %v783_v17 }
 0x203   :  { %v786_v20 = vrot.slane %v785_v19, 1 }
 0x205   :  { %v787_v21 = vadd.f32 %v786_v20, %v785_v19 }
 0x207   :  { %806 = vpush %v787_v21 }
 0x238   :  { %s807_s8 = spop %806 }
 0x239   :  { %v789_v22 = vstv %s807_s8 }
 0x23a   :  { %790 = vst [vmem:[#allocation5] sm:$0xff] %v789_v22 }
 0x23b   :  { %848 = shalt.err (!%p845_p12)
}
 0x23c   :  { %s849_s12 = scalar_lea.hbm %s1114_s3, 128 }
 0x23d   :  { %p850_p13 = scmp.ne.s32.totalorder %s1114_s3, %s849_s12  ;;  %p853_p0 = scmp.lt.u32.totalorder %s849_s12, %s1114_s3 }
 0x23f   :  { %p855_p1 = pnand %p853_p0, %p850_p13 }
 0x241   :  { %858 = shalt.err (!%p855_p1)
}
 0x242   :  { %800 = dma.vmem_to_hbm [thread:$0]  %s798_s2, 128, %s1114_s3, [#allocation4]  }
 0x243   :  { %861 = dma.done.wait [#allocation4], 128  }
 0x244   :  { %862 = vsyncadd [#allocation4], 4294967168 }
 0x245   :  { %804 = vsyncpa [#allocation3], 1 }
 0x246   :  { %805 = vsyncpa [#allocation4], 1 }

</bundles_post_ra>
